<compile_context>
chip_gen: v7x
topology: tpu7x:2x2x1
jax: 0.10.0
libtpu: 0.0.40
codegen_flags: <defaults>
</compile_context>

<pallas_src>
import functools

import numpy as np
import jax
import jax.numpy as jnp
from jax import lax
from jax.experimental import pallas as pl
from jax.experimental.pallas import tpu as pltpu


# ---------------- Pallas kernel ----------------

def _midas_mse_kernel(pred_ref, targ_ref, mask_ref, out_ref, acc_sq, acc_m,
                      *, n_cols, tile, reduction_type, needs_col_mask):
    k = pl.program_id(0)
    nk = pl.num_programs(0)

    @pl.when(k == 0)
    def _init():
        acc_sq[...] = jnp.zeros_like(acc_sq)
        acc_m[...] = jnp.zeros_like(acc_m)

    p = pred_ref[...].astype(jnp.float32)
    t = targ_ref[...].astype(jnp.float32)
    m = mask_ref[...].astype(jnp.float32)

    if needs_col_mask:
        # zero out lanes past the true column count in the (partial) last tile
        col = k * tile + lax.broadcasted_iota(jnp.int32, p.shape, 1)
        valid = col < n_cols
        m = jnp.where(valid, m, 0.0)
        diff = jnp.where(valid, p - t, 0.0)
    else:
        diff = p - t

    # pure-VPU elementwise accumulate; cross-lane reduce deferred to finalize
    acc_sq[...] += diff * diff * m
    acc_m[...] += m

    @pl.when(k == nk - 1)
    def _finalize():
        image_loss = jnp.sum(acc_sq[...], axis=-1, keepdims=True)    # (B, 1)
        summed_mask = jnp.sum(acc_m[...], axis=-1, keepdims=True)    # (B, 1)
        if reduction_type == "batch":
            divisor = 2.0 * jnp.sum(summed_mask)
            total = jnp.sum(image_loss)
            loss = jnp.where(divisor > 0.0,
                             total / jnp.where(divisor > 0.0, divisor, 1.0),
                             0.0)
        else:  # "image"
            div = 2.0 * summed_mask
            per = jnp.where(div > 0.0,
                            image_loss / jnp.where(div > 0.0, div, 1.0),
                            image_loss)
            loss = jnp.sum(per) / jnp.float32(per.shape[0])
        out_ref[...] = loss.reshape(1, 1).astype(jnp.float32)


# ---------------- wrapper ----------------

def midas_mse_loss(prediction, target, mask, *, reduction_type="batch",
                   max_tile_bytes=1 << 20):
    """MiDaS MSE data loss. prediction/target/mask: [B, H, W] (any float dtype)."""
    assert reduction_type in ("batch", "image")
    assert prediction.shape == target.shape == mask.shape

    b = prediction.shape[0]
    n = int(np.prod(prediction.shape[1:]))

    if mask.dtype == jnp.bool_:
        mask = mask.astype(prediction.dtype)

    # flatten (H, W) -> lane-dense N; keep native HBM dtype (cast happens in-kernel)
    p2 = prediction.reshape(b, n)
    t2 = target.reshape(b, n)
    m2 = mask.reshape(b, n)

    # lane-axis tile: ~max_tile_bytes of f32 per (B, tile) buffer, multiple of 128
    max_tile = max(128, (max_tile_bytes // (4 * b)) // 128 * 128)
    if n <= max_tile:
        tile = n                       # single full block (any width allowed)
        grid_n = 1
        needs_col_mask = False
    else:
        tile = max_tile
        grid_n = pl.cdiv(n, tile)
        needs_col_mask = (n % tile) != 0

    kernel = functools.partial(
        _midas_mse_kernel,
        n_cols=n, tile=tile, reduction_type=reduction_type,
        needs_col_mask=needs_col_mask)

    in_spec = pl.BlockSpec((b, tile), lambda k: (0, k))

    out = pl.pallas_call(
        kernel,
        out_shape=jax.ShapeDtypeStruct((1, 1), jnp.float32),
        grid_spec=pltpu.PrefetchScalarGridSpec(
            num_scalar_prefetch=0,
            grid=(grid_n,),
            in_specs=[in_spec, in_spec, in_spec],
            out_specs=pl.BlockSpec((1, 1), lambda k: (0, 0)),
            scratch_shapes=[pltpu.VMEM((b, tile), jnp.float32),
                            pltpu.VMEM((b, tile), jnp.float32)],
        ),
        compiler_params=pltpu.CompilerParams(
            dimension_semantics=("arbitrary",)),
    )(p2, t2, m2)
    return out[0, 0]


# ---------------- module equivalent ----------------

class MiDaSMSELoss:
    """Data term from the MiDaS paper (masked MSE with 'batch'/'image' reduction)."""

    def __init__(self, reduction_type="batch"):
        assert reduction_type in ("batch", "image")
        self.reduction_type = reduction_type

    def forward(self, prediction, target, mask):
        return midas_mse_loss(prediction, target, mask,
                              reduction_type=self.reduction_type)

    __call__ = forward


# ---------------- reference (plain JAX, torch semantics) ----------------

def _ref_midas_mse(prediction, target, mask, reduction_type):
    p = prediction.astype(jnp.float32)
    t = target.astype(jnp.float32)
    m = mask.astype(jnp.float32)
    b = p.shape[0]
    summed_mask = jnp.sum(m.reshape(b, -1), axis=1)
    image_loss = jnp.sum(((p - t) ** 2 * m).reshape(b, -1), axis=1)
    div = 2.0 * summed_mask
    if reduction_type == "batch":
        d = jnp.sum(div)
        return jnp.where(d > 0.0, jnp.sum(image_loss) / jnp.where(d > 0.0, d, 1.0), 0.0)
    per = jnp.where(div > 0.0, image_loss / jnp.where(div > 0.0, div, 1.0), image_loss)
    return jnp.mean(per)


# ---------------- demo / smoke test ----------------

if __name__ == "__main__":
    key = jax.random.PRNGKey(0)
    k1, k2, k3, k4, k5, k6 = jax.random.split(key, 6)

    # 1) 'batch' reduction, shape per spec (1, 32, mult)
    B, H, W = 1, 32, 48
    pred = jax.random.normal(k1, (B, H, W), dtype=jnp.float32)
    targ = jax.random.normal(k2, (B, H, W), dtype=jnp.float32)
    mask = (jax.random.uniform(k3, (B, H, W)) > 0.3).astype(jnp.float32)

    loss_batch = MiDaSMSELoss("batch")(pred, targ, mask)
    ref_batch = _ref_midas_mse(pred, targ, mask, "batch")

    # 2) 'image' reduction, B=2, second image has an all-zero mask (guard path)
    B2, H2, W2 = 2, 32, 40
    pred2 = jax.random.normal(k4, (B2, H2, W2), dtype=jnp.float32)
    targ2 = jax.random.normal(k5, (B2, H2, W2), dtype=jnp.float32)
    mask2 = (jax.random.uniform(k6, (B2, H2, W2)) > 0.5).astype(jnp.float32)
    mask2 = mask2.at[1].set(0.0)

    loss_image = MiDaSMSELoss("image")(pred2, targ2, mask2)
    ref_image = _ref_midas_mse(pred2, targ2, mask2, "image")

    # 3) tiled path with a partial last tile (force TILE=128 over N=1440)
    predt = pred.reshape(1, 32, 48)[:, :, :45]
    targt = targ.reshape(1, 32, 48)[:, :, :45]
    maskt = mask.reshape(1, 32, 48)[:, :, :45]
    loss_tiled = midas_mse_loss(predt, targt, maskt,
                                reduction_type="batch", max_tile_bytes=512)
    ref_tiled = _ref_midas_mse(predt, targt, maskt, "batch")

    # 4) bf16 inputs streamed narrow into the kernel (cast happens per-tile)
    loss_bf16 = midas_mse_loss(pred.astype(jnp.bfloat16),
                               targ.astype(jnp.bfloat16),
                               mask.astype(jnp.bfloat16),
                               reduction_type="batch")
    ref_bf16 = _ref_midas_mse(pred.astype(jnp.bfloat16),
                              targ.astype(jnp.bfloat16),
                              mask.astype(jnp.bfloat16), "batch")

    # 5) all-zero mask -> zero loss (divisor guard)
    loss_zero = midas_mse_loss(pred, targ, jnp.zeros_like(mask),
                               reduction_type="batch")

    jax.block_until_ready(
        (loss_batch, loss_image, loss_tiled, loss_bf16, loss_zero))

    assert jnp.allclose(loss_batch, ref_batch, atol=1e-5), (loss_batch, ref_batch)
    assert jnp.allclose(loss_image, ref_image, atol=1e-5), (loss_image, ref_image)
    assert jnp.allclose(loss_tiled, ref_tiled, atol=1e-5), (loss_tiled, ref_tiled)
    assert jnp.allclose(loss_bf16, ref_bf16, atol=1e-5), (loss_bf16, ref_bf16)
    assert jnp.allclose(loss_zero, 0.0, atol=1e-7), loss_zero

    print("KERNEL_OK")
</pallas_src>

<mosaic_0001>
module attributes {stable_mosaic.version = 11 : i64} {
  func.func @_midas_mse_kernel(%arg0: i32, %arg1: memref<1x1536xf32, #tpu.memory_space<vmem>>, %arg2: memref<1x1536xf32, #tpu.memory_space<vmem>>, %arg3: memref<1x1536xf32, #tpu.memory_space<vmem>>, %arg4: memref<1x1xf32, #tpu.memory_space<vmem>>, %arg5: memref<1x1536xf32, #tpu.memory_space<vmem>>, %arg6: memref<1x1536xf32, #tpu.memory_space<vmem>>) attributes {dimension_semantics = [#tpu.dimension_semantics<arbitrary>], iteration_bounds = array<i64: 1>, scalar_prefetch = 0 : i64, scratch_operands = 2 : i64, tpu.core_type = #tpu.core_type<tc>, window_params = [{transform_indices = @transform_0, window_bounds = array<i64: 1, 1536>}, {transform_indices = @transform_1, window_bounds = array<i64: 1, 1536>}, {transform_indices = @transform_2, window_bounds = array<i64: 1, 1536>}, {pipeline_mode = #tpu.pipeline_mode<synchronous>, transform_indices = @transform_3, window_bounds = array<i64: 1, 1>}]} {
    %c0_i32 = arith.constant 0 : i32
    %0 = arith.cmpi eq, %arg0, %c0_i32 : i32
    %1 = arith.extui %0 : i1 to i32
    %c0_i32_0 = arith.constant 0 : i32
    %2 = arith.cmpi ne, %1, %c0_i32_0 : i32
    scf.if %2 {
      %cst = arith.constant 0.000000e+00 : f32
      %18 = vector.broadcast %cst : f32 to vector<1x1536xf32>
      %c0_16 = arith.constant 0 : index
      %c0_17 = arith.constant 0 : index
      %19 = vector.load %arg5[%c0_16, %c0_17] : memref<1x1536xf32, #tpu.memory_space<vmem>>, vector<1x1536xf32>
      tpu.vector_store %arg5[%c0_16, %c0_17], %18 {strides = array<i32>} : memref<1x1536xf32, #tpu.memory_space<vmem>>, vector<1x1536xf32>,
      %cst_18 = arith.constant 0.000000e+00 : f32
      %20 = vector.broadcast %cst_18 : f32 to vector<1x1536xf32>
      %c0_19 = arith.constant 0 : index
      %c0_20 = arith.constant 0 : index
      %21 = vector.load %arg6[%c0_19, %c0_20] : memref<1x1536xf32, #tpu.memory_space<vmem>>, vector<1x1536xf32>
      tpu.vector_store %arg6[%c0_19, %c0_20], %20 {strides = array<i32>} : memref<1x1536xf32, #tpu.memory_space<vmem>>, vector<1x1536xf32>,
    } else {
    }
    %c0 = arith.constant 0 : index
    %c0_1 = arith.constant 0 : index
    %3 = vector.load %arg1[%c0, %c0_1] : memref<1x1536xf32, #tpu.memory_space<vmem>>, vector<1x1536xf32>
    %c0_2 = arith.constant 0 : index
    %c0_3 = arith.constant 0 : index
    %4 = vector.load %arg2[%c0_2, %c0_3] : memref<1x1536xf32, #tpu.memory_space<vmem>>, vector<1x1536xf32>
    %c0_4 = arith.constant 0 : index
    %c0_5 = arith.constant 0 : index
    %5 = vector.load %arg3[%c0_4, %c0_5] : memref<1x1536xf32, #tpu.memory_space<vmem>>, vector<1x1536xf32>
    %6 = arith.subf %3, %4 : vector<1x1536xf32>
    %c0_6 = arith.constant 0 : index
    %c0_7 = arith.constant 0 : index
    %7 = vector.load %arg5[%c0_6, %c0_7] : memref<1x1536xf32, #tpu.memory_space<vmem>>, vector<1x1536xf32>
    %8 = arith.mulf %6, %6 : vector<1x1536xf32>
    %9 = arith.mulf %8, %5 : vector<1x1536xf32>
    %10 = arith.addf %7, %9 : vector<1x1536xf32>
    %c0_8 = arith.constant 0 : index
    %c0_9 = arith.constant 0 : index
    %11 = vector.load %arg5[%c0_8, %c0_9] : memref<1x1536xf32, #tpu.memory_space<vmem>>, vector<1x1536xf32>
    tpu.vector_store %arg5[%c0_8, %c0_9], %10 {strides = array<i32>} : memref<1x1536xf32, #tpu.memory_space<vmem>>, vector<1x1536xf32>,
    %c0_10 = arith.constant 0 : index
    %c0_11 = arith.constant 0 : index
    %12 = vector.load %arg6[%c0_10, %c0_11] : memref<1x1536xf32, #tpu.memory_space<vmem>>, vector<1x1536xf32>
    %13 = arith.addf %12, %5 : vector<1x1536xf32>
    %c0_12 = arith.constant 0 : index
    %c0_13 = arith.constant 0 : index
    %14 = vector.load %arg6[%c0_12, %c0_13] : memref<1x1536xf32, #tpu.memory_space<vmem>>, vector<1x1536xf32>
    tpu.vector_store %arg6[%c0_12, %c0_13], %13 {strides = array<i32>} : memref<1x1536xf32, #tpu.memory_space<vmem>>, vector<1x1536xf32>,
    %c0_i32_14 = arith.constant 0 : i32
    %15 = arith.cmpi eq, %arg0, %c0_i32_14 : i32
    %16 = arith.extui %15 : i1 to i32
    %c0_i32_15 = arith.constant 0 : i32
    %17 = arith.cmpi ne, %16, %c0_i32_15 : i32
    scf.if %17 {
      %c0_16 = arith.constant 0 : index
      %c0_17 = arith.constant 0 : index
      %18 = vector.load %arg5[%c0_16, %c0_17] : memref<1x1536xf32, #tpu.memory_space<vmem>>, vector<1x1536xf32>
      %cst = arith.constant dense<0.000000e+00> : vector<1xf32>
      %19 = vector.multi_reduction <add>, %18, %cst [1] : vector<1x1536xf32> to vector<1xf32>
      %20 = vector.shape_cast %19 : vector<1xf32> to vector<1x1xf32>
      %c0_18 = arith.constant 0 : index
      %c0_19 = arith.constant 0 : index
      %21 = vector.load %arg6[%c0_18, %c0_19] : memref<1x1536xf32, #tpu.memory_space<vmem>>, vector<1x1536xf32>
      %cst_20 = arith.constant dense<0.000000e+00> : vector<1xf32>
      %22 = vector.multi_reduction <add>, %21, %cst_20 [1] : vector<1x1536xf32> to vector<1xf32>
      %23 = vector.shape_cast %22 : vector<1xf32> to vector<1x1xf32>
      %24 = vector.shape_cast %23 : vector<1x1xf32> to vector<1x1x1xf32>
      %cst_21 = arith.constant dense<0.000000e+00> : vector<1xf32>
      %25 = vector.multi_reduction <add>, %24, %cst_21 [1, 2] : vector<1x1x1xf32> to vector<1xf32>
      %26 = vector.shape_cast %25 : vector<1xf32> to vector<1x1x1xf32>
      %27 = vector.extract %26[0, 0, 0] : f32 from vector<1x1x1xf32>
      %cst_22 = arith.constant 2.000000e+00 : f32
      %28 = arith.mulf %cst_22, %27 : f32
      %29 = vector.shape_cast %20 : vector<1x1xf32> to vector<1x1x1xf32>
      %cst_23 = arith.constant dense<0.000000e+00> : vector<1xf32>
      %30 = vector.multi_reduction <add>, %29, %cst_23 [1, 2] : vector<1x1x1xf32> to vector<1xf32>
      %31 = vector.shape_cast %30 : vector<1xf32> to vector<1x1x1xf32>
      %32 = vector.extract %31[0, 0, 0] : f32 from vector<1x1x1xf32>
      %cst_24 = arith.constant 0.000000e+00 : f32
      %33 = arith.cmpf ogt, %28, %cst_24 : f32
      %cst_25 = arith.constant 0.000000e+00 : f32
      %34 = arith.cmpf ogt, %28, %cst_25 : f32
      %cst_26 = arith.constant 1.000000e+00 : f32
      %35 = arith.select %34, %28, %cst_26 : f32
      %36 = arith.divf %32, %35 : f32
      %cst_27 = arith.constant 0.000000e+00 : f32
      %37 = arith.select %33, %36, %cst_27 : f32
      %38 = vector.broadcast %37 : f32 to vector<1x1xf32>
      %c0_28 = arith.constant 0 : index
      %c0_29 = arith.constant 0 : index
      %39 = vector.load %arg4[%c0_28, %c0_29] : memref<1x1xf32, #tpu.memory_space<vmem>>, vector<1x1xf32>
      tpu.vector_store %arg4[%c0_28, %c0_29], %38 {strides = array<i32>} : memref<1x1xf32, #tpu.memory_space<vmem>>, vector<1x1xf32>,
    } else {
    }
    return
  }
  func.func @transform_0(%arg0: i32) -> (i32, i32) {
    %c0_i32 = arith.constant 0 : i32
    %c0_i32_0 = arith.constant 0 : i32
    return %c0_i32, %arg0 : i32, i32
  }
  func.func @transform_1(%arg0: i32) -> (i32, i32) {
    %c0_i32 = arith.constant 0 : i32
    %c0_i32_0 = arith.constant 0 : i32
    return %c0_i32, %arg0 : i32, i32
  }
  func.func @transform_2(%arg0: i32) -> (i32, i32) {
    %c0_i32 = arith.constant 0 : i32
    %c0_i32_0 = arith.constant 0 : i32
    return %c0_i32, %arg0 : i32, i32
  }
  func.func @transform_3(%arg0: i32) -> (i32, i32) {
    %c0_i32 = arith.constant 0 : i32
    %c0_i32_0 = arith.constant 0 : i32
    %c0_i32_1 = arith.constant 0 : i32
    return %c0_i32, %c0_i32_0 : i32, i32
  }
}

</mosaic_0001>

<bundles_post_ra>
// kernel: tpu_custom_call.1
= control target key start
LH: loop header
LB: loop body
LE: loop exit
PB: predicated region body
PF: predicated region fallthrough
CT: control target
= control target key end

     0   :  { %8 = vsyncpa [#allocation5], 0  ;;  %s553_s0 = inlined_call_operand.hbm [shape: f32[1,1536], index: 0, kind: input, shape index: {}]   ;;  %s554_s1 = inlined_call_operand.hbm [shape: f32[1,1536], index: 1, kind: input, shape index: {}]   ;;  %s555_s2 = inlined_call_operand.hbm [shape: f32[1,1536], index: 2, kind: input, shape index: {}]   ;;  %s556_s3 = inlined_call_operand.hbm [shape: f32[1,1], index: 3, kind: output, shape index: {}]  }
   0x1   :  { %9 = vsyncpa [#allocation8], 0 }
   0x2   :  { %10 = vsyncpa [#allocation6], 0  ;;  %s410_s12 = smov [#allocation7]   ;;  %s411_s14 = smov [#allocation4]  }
   0x3   :  { %s27_s13 = sshll.u32 %s410_s12, 4  ;;  %s17_s15 = sshll.u32 %s411_s14, 4  ;;  %s28_s13 = int_to_ptr.vmem [resolvable:$true] %s27_s13  ;;  %s18_s15 = int_to_ptr.vmem [resolvable:$true] %s17_s15 }
   0x4   :  { %s316_s18 = scalar_lea.hbm %s554_s1, 192 }
   0x5   :  { %p317_p0 = scmp.ne.s32.totalorder %s554_s1, %s316_s18  ;;  %p320_p1 = scmp.lt.u32.totalorder %s316_s18, %s554_s1 }
   0x7   :  { %p322_p2 = pnand %p320_p1, %p317_p0 }
   0x9   :  { %325 = shalt.err (!%p322_p2)
}
   0xa   :  { %s326_s23 = scalar_lea.vmem %s28_s13, 192  ;;  %p331_p4 = scmp.lt.s32.totalorder %s28_s13, %s28_s13 }
   0xb   :  { %p327_p3 = scmp.ne.s32.totalorder %s28_s13, %s326_s23  ;;  %p332_p5 = scmp.lt.s32.totalorder %s326_s23, %s326_s23 }
   0xd   :  { %p333_p6 = por %p332_p5, %p331_p4 }
   0xf   :  { %p334_p7 = pnand %p333_p6, %p327_p3 }
  0x11   :  { %337 = shalt.err (!%p334_p7)
}
  0x12   :  { %30 = dma.hbm_to_vmem [thread:$0]  %s554_s1, 192, %s28_s13, [#allocation8]  }
  0x13   :  { %s338_s28 = scalar_lea.hbm %s553_s0, 192 }
  0x14   :  { %p339_p8 = scmp.ne.s32.totalorder %s553_s0, %s338_s28  ;;  %p342_p9 = scmp.lt.u32.totalorder %s338_s28, %s553_s0 }
  0x16   :  { %p344_p10 = pnand %p342_p9, %p339_p8 }
  0x18   :  { %347 = shalt.err (!%p344_p10)
}
  0x19   :  { %s348_s6 = scalar_lea.vmem %s18_s15, 192  ;;  %p353_p12 = scmp.lt.s32.totalorder %s18_s15, %s18_s15 }
  0x1a   :  { %p349_p11 = scmp.ne.s32.totalorder %s18_s15, %s348_s6  ;;  %p354_p13 = scmp.lt.s32.totalorder %s348_s6, %s348_s6 }
  0x1c   :  { %p355_p0 = por %p354_p13, %p353_p12 }
  0x1e   :  { %p356_p1 = pnand %p355_p0, %p349_p11 }
  0x20   :  { %359 = shalt.err (!%p356_p1)
}
  0x21   :  { %20 = dma.hbm_to_vmem [thread:$0]  %s553_s0, 192, %s18_s15, [#allocation5]  }
  0x22   :  { %s412_s8 = smov [#allocation9]   ;;  %s360_s12 = scalar_lea.hbm %s555_s2, 192 }
  0x23   :  { %s37_s9 = sshll.u32 %s412_s8, 4  ;;  %p361_p2 = scmp.ne.s32.totalorder %s555_s2, %s360_s12  ;;  %s38_s9 = int_to_ptr.vmem [resolvable:$true] %s37_s9 }
  0x24   :  { %p364_p3 = scmp.lt.u32.totalorder %s360_s12, %s555_s2 }
  0x26   :  { %p366_p4 = pnand %p364_p3, %p361_p2 }
  0x28   :  { %369 = shalt.err (!%p366_p4)
}
  0x29   :  { %s370_s18 = scalar_lea.vmem %s38_s9, 192  ;;  %p375_p6 = scmp.lt.s32.totalorder %s38_s9, %s38_s9 }
  0x2a   :  { %p371_p5 = scmp.ne.s32.totalorder %s38_s9, %s370_s18  ;;  %p376_p7 = scmp.lt.s32.totalorder %s370_s18, %s370_s18 }
  0x2c   :  { %p377_p8 = por %p376_p7, %p375_p6 }
  0x2e   :  { %p378_p9 = pnand %p377_p8, %p371_p5 }
  0x30   :  { %381 = shalt.err (!%p378_p9)
}
  0x31   :  { %40 = dma.hbm_to_vmem [thread:$0]  %s555_s2, 192, %s38_s9, [#allocation8]  }
  0x32   :  { %404 = dma.done.wait [#allocation5], 192  }
  0x33   :  { %405 = vsyncadd [#allocation5], 4294967104 }
  0x34   :  { %406 = dma.done.wait [#allocation8], 384  }
  0x35   :  { %407 = vsyncadd [#allocation8], 4294966912  ;;  %v55_v0 = vlaneseq  ;;  %v413_v3 = vmov 0.0   ;;  %v62_v5 = vld [vmem:[#allocation4] sm:$0xff]  ;;  %v63_v6 = vld [vmem:[#allocation4 + $0x8] sm:$0xf] }
  0x36   :  { %v64_v7 = vld [vmem:[#allocation7] sm:$0xff]  ;;  %v65_v10 = vld [vmem:[#allocation7 + $0x8] sm:$0xf]  ;;  %v66_v11 = vld [vmem:[#allocation9] sm:$0xff]  ;;  %vm157_vm1 = vcmask 1040384   ;;  %s414_s23 = smov [#allocation10]  }
  0x37   :  { %vm471_vm0 = vcmp.lt.s32.totalorder %v55_v0, 512  ;;  %v475_v2 = vshrl.u32 %v55_v0, 7  ;;  %v67_v12 = vld [vmem:[#allocation9 + $0x8] sm:$0xf]  ;;  %v68_v13 = vsub.f32 %v62_v5, %v64_v7  ;;  %v69_v15 = vsub.f32 %v63_v6, %v65_v10  ;;  %s293_s24 = sshll.u32 %s414_s23, 4  ;;  %s294_s24 = int_to_ptr.vmem [resolvable:$true] %s293_s24 }
  0x38   :  { %61 = vst.msk [vmem:[#allocation3 + $0x8] sm:$0xf] %vm471_vm0, %v413_v3  ;;  %59 = vst.msk [vmem:[#allocation2 + $0x8] sm:$0xf] %vm471_vm0, %v413_v3  ;;  %vm285_vm2 = vcmask 0   ;;  %s382_s25 = scalar_lea.vmem %s294_s24, 16  ;;  %p387_p12 = scmp.lt.s32.totalorder %s294_s24, %s294_s24 }
  0x39   :  { %v482_v4 = vsub.s32 0, %v475_v2  ;;  %v485_v8 = vsub.s32 1, %v475_v2  ;;  %v488_v9 = vsub.s32 2, %v475_v2  ;;  %v491_v14 = vsub.s32 3, %v475_v2  ;;  %p383_p11 = scmp.ne.s32.totalorder %s294_s24, %s382_s25  ;;  %s386_s26 = scalar_lea.vmem %s294_s24, 32 }
  0x3a   :  { %v72_v16 = vmul.f32 %v68_v13, %v68_v13  ;;  %v115_v18 = vsub.s32 4, %v475_v2  ;;  %v73_v19 = vmul.f32 %v69_v15, %v69_v15  ;;  %v119_v27 = vsub.s32 5, %v475_v2  ;;  %p388_p13 = scmp.lt.s32.totalorder %s386_s26, %s382_s25 }
  0x3b   :  { %v190_v21 = vrot.slane %v66_v11, %v482_v4  ;;  %v194_v22 = vrot.slane %v66_v11, %v485_v8  ;;  %v198_v24 = vrot.slane %v66_v11, %v488_v9  ;;  %v202_v25 = vrot.slane %v66_v11, %v491_v14 }
  0x3c   :  { %v74_v23 = vmul.f32 %v72_v16, %v66_v11  ;;  %v75_v26 = vmul.f32 %v73_v19, %v67_v12  ;;  %v123_v32 = vsub.s32 6, %v475_v2  ;;  %v206_v33 = vrot.slane %v66_v11, %v115_v18  ;;  %p389_p0 = por %p388_p13, %p387_p12 }
  0x3d   :  { %v247_v29 = vsel %vm157_vm1, %v190_v21, 0.0  ;;  %v248_v30 = vsel %vm157_vm1, %v194_v22, 0.0  ;;  %v250_v31 = vsel %vm157_vm1, %v198_v24, 0.0  ;;  %v252_v35 = vsel %vm157_vm1, %v202_v25, 0.0 }
  0x3e   :  { %v249_v34 = vadd.f32 %v248_v30, %v247_v29  ;;  %v127_v37 = vsub.s32 7, %v475_v2  ;;  %v210_v38 = vrot.slane %v66_v11, %v119_v27  ;;  %v104_v40 = vrot.slane %v74_v23, %v485_v8  ;;  %p390_p1 = pnand %p389_p0, %p383_p11 }
  0x3f   :  { %v85_v17 = vld [vmem:[#allocation3 + $0x8] sm:$0xf]  ;;  %v71_v28 = vld [vmem:[#allocation2 + $0x8] sm:$0xf]  ;;  %v108_v41 = vrot.slane %v74_v23, %v488_v9  ;;  %v100_v42 = vrot.slane %v74_v23, %v482_v4  ;;  %v214_v43 = vrot.slane %v66_v11, %v123_v32  ;;  %v254_v45 = vsel %vm157_vm1, %v206_v33, 0.0 }
  0x40   :  { %v87_v20 = vadd.f32 %v85_v17, %v67_v12  ;;  %v77_v36 = vadd.f32 %v75_v26, %v71_v28  ;;  %v251_v39 = vadd.f32 %v250_v31, %v249_v34  ;;  %v112_v47 = vrot.slane %v74_v23, %v491_v14 }
  0x41   :  { %v158_v48 = vsel %vm157_vm1, %v100_v42, 0.0  ;;  %v159_v49 = vsel %vm157_vm1, %v104_v40, 0.0  ;;  %v218_v50 = vrot.slane %v66_v11, %v127_v37  ;;  %v256_v51 = vsel %vm157_vm1, %v210_v38, 0.0 }
  0x42   :  { %89 = vst.msk [vmem:[#allocation3 + $0x8] sm:$0xf] %vm471_vm0, %v87_v20  ;;  %83 = vst.msk [vmem:[#allocation2 + $0x8] sm:$0xf] %vm471_vm0, %v77_v36  ;;  %v253_v44 = vadd.f32 %v252_v35, %v251_v39  ;;  %v161_v52 = vsel %vm157_vm1, %v108_v41, 0.0  ;;  %v116_v54 = vrot.slane %v74_v23, %v115_v18  ;;  %v160_v55 = vadd.f32 %v159_v49, %v158_v48 }
  0x43   :  { %v258_v57 = vsel %vm157_vm1, %v214_v43, 0.0  ;;  %v120_v59 = vrot.slane %v74_v23, %v119_v27  ;;  %v163_v61 = vsel %vm157_vm1, %v112_v47, 0.0  ;;  %v260_v63 = vsel %vm157_vm1, %v218_v50, 0.0 }
  0x44   :  { %v255_v53 = vadd.f32 %v254_v45, %v253_v44  ;;  %v162_v60 = vadd.f32 %v161_v52, %v160_v55  ;;  %v124_v1 = vrot.slane %v74_v23, %v123_v32  ;;  %v165_v2 = vsel %vm157_vm1, %v116_v54, 0.0 }
  0x45   :  { %v128_v11 = vrot.slane %v74_v23, %v127_v37  ;;  %v167_v12 = vsel %vm157_vm1, %v120_v59, 0.0 }
  0x46   :  { %v257_v58 = vadd.f32 %v256_v51, %v255_v53  ;;  %v164_v7 = vadd.f32 %v163_v61, %v162_v60  ;;  %v169_v19 = vsel %vm157_vm1, %v124_v1, 0.0 }
  0x47   :  { %v171_v23 = vsel %vm157_vm1, %v128_v11, 0.0 }
  0x48   :  { %v259_v0 = vadd.f32 %v258_v57, %v257_v58  ;;  %v166_v16 = vadd.f32 %v165_v2, %v164_v7 }
  0x49   :  { %v184_v46 = vld [vmem:[#allocation3 + $0x8] sm:$0xf]  ;;  %v94_v6 = vld [vmem:[#allocation2 + $0x8] sm:$0xf] }
  0x4a   :  { %v222_v56 = vrot.slane %v184_v46, %v482_v4  ;;  %v226_v62 = vrot.slane %v184_v46, %v485_v8  ;;  %v230_v3 = vrot.slane %v184_v46, %v488_v9  ;;  %v261_v10 = vadd.f32 %v260_v63, %v259_v0 }
  0x4b   :  { %v234_v13 = vrot.slane %v184_v46, %v491_v14  ;;  %v132_v18 = vrot.slane %v94_v6, %v482_v4  ;;  %v168_v21 = vadd.f32 %v167_v12, %v166_v16  ;;  %v136_v24 = vrot.slane %v94_v6, %v485_v8 }
  0x4c   :  { %v262_v5 = vsel %vm157_vm1, %v222_v56, 0.0  ;;  %v264_v15 = vsel %vm157_vm1, %v226_v62, 0.0  ;;  %v266_v20 = vsel %vm157_vm1, %v230_v3, 0.0  ;;  %v140_v28 = vrot.slane %v94_v6, %v488_v9 }
  0x4d   :  { %v263_v17 = vadd.f32 %v262_v5, %v261_v10  ;;  %v268_v25 = vsel %vm157_vm1, %v234_v13, 0.0  ;;  %v170_v26 = vadd.f32 %v169_v19, %v168_v21  ;;  %v173_v29 = vsel %vm157_vm1, %v132_v18, 0.0 }
  0x4e   :  { %v144_v31 = vrot.slane %v94_v6, %v491_v14  ;;  %v175_v32 = vsel %vm157_vm1, %v136_v24, 0.0  ;;  %v177_v8 = vsel %vm157_vm1, %v140_v28, 0.0 }
  0x4f   :  { %v265_v22 = vadd.f32 %v264_v15, %v263_v17  ;;  %v172_v30 = vadd.f32 %v171_v23, %v170_v26 }
  0x50   :  { %v179_v35 = vsel %vm157_vm1, %v144_v31, 0.0 }
  0x51   :  { %v267_v27 = vadd.f32 %v266_v20, %v265_v22  ;;  %v174_v33 = vadd.f32 %v173_v29, %v172_v30 }
  0x53   :  { %v269_v4 = vadd.f32 %v268_v25, %v267_v27  ;;  %v176_v34 = vadd.f32 %v175_v32, %v174_v33 }
  0x55   :  { %270 = vadd.xlane.f32.xlu0 %v269_v4  ;;  %v178_v36 = vadd.f32 %v177_v8, %v176_v34 }
  0x57   :  { %v180_v37 = vadd.f32 %v179_v35, %v178_v36 }
  0x59   :  { %181 = vadd.xlane.f32.xlu0 %v180_v37 }
  0xe2   :  { %v271_v38 = vpop.xlane.xlu0 %270 }
  0xe3   :  { %303 = vpush %v271_v38 }
  0xe6   :  { %v182_v9 = vpop.xlane.xlu0 %181 }
  0xe7   :  { %305 = vpush %v182_v9 }
 0x114   :  { %s304_s2 = spop %303 }
 0x115   :  { %s274_s19 = smul.f32 2.0, %s304_s2 }
 0x117   :  { %p277_p10 = scmp.gt.f32.partialorder %s274_s19, 0.0 }
 0x118   :  { %s306_s20 = spop %305 }
 0x119   :  { %s560_s19 = smov (!%p277_p10, %s274_s19), 1.0 }
 0x11a   :  { %v279_v14 = vstv %s560_s19 }
 0x11b   :  { %314 = vrcp.f32 %v279_v14 }
 0x125   :  { %v315_v39 = vpop.eup %314 }
 0x126   :  { %307 = vpush %v315_v39 }
 0x157   :  { %s308_s21 = spop %307 }
 0x158   :  { %s282_s22 = smul.f32 %s308_s21, %s306_s20 }
 0x15a   :  { %s562_s22 = smov (!%p277_p10, %s282_s22), 0.0 }
 0x15b   :  { %v284_v40 = vstv %s562_s22 }
 0x15c   :  { %286 = vst.msk [vmem:[#allocation10] sm:$0x1] %vm285_vm2, %v284_v40 }
 0x15d   :  { %393 = shalt.err (!%p390_p1)
}
 0x15e   :  { %s394_s29 = scalar_lea.hbm %s556_s3, 16 }
 0x15f   :  { %p395_p2 = scmp.ne.s32.totalorder %s556_s3, %s394_s29  ;;  %p398_p3 = scmp.lt.u32.totalorder %s394_s29, %s556_s3 }
 0x161   :  { %p400_p4 = pnand %p398_p3, %p395_p2 }
 0x163   :  { %403 = shalt.err (!%p400_p4)
}
 0x164   :  { %296 = dma.vmem_to_hbm [thread:$0]  %s294_s24, 16, %s556_s3, [#allocation6]  }
 0x165   :  { %408 = dma.done.wait [#allocation6], 16  }
 0x166   :  { %409 = vsyncadd [#allocation6], 4294967280 }
 0x167   :  { %300 = vsyncpa [#allocation5], 1 }
 0x168   :  { %301 = vsyncpa [#allocation8], 1 }
 0x169   :  { %302 = vsyncpa [#allocation6], 1 }

</bundles_post_ra>
